<compile_context>
chip_gen: v6e
topology: v6e:2x2x1
jax: 0.10.0
libtpu: 0.0.40
codegen_flags: <defaults>
</compile_context>

<pallas_src>
import functools

import jax
import jax.numpy as jnp
from jax.experimental import pallas as pl
from jax.experimental.pallas import tpu as pltpu


INTERM_DIM = 16                      # per-branch hidden width
IN_DIMS = (64, 32, 16)               # fc1 / fc2 / fc3 input widths
PACKED_DIM = sum(IN_DIMS)            # 112  (<= 128 lanes -> lane-dense HBM tiles)
HIDDEN_DIM = 3 * INTERM_DIM          # 48


def _round_up(x, m):
    return ((x + m - 1) // m) * m


def _lossnet_kernel(x_ref, wbd_ref, bcat_ref, w4_ref, b4_ref, out_ref, *,
                    lane_dense_out, precision):
    # Hidden layer: one MXU matmul against the block-diagonal (112, 48)
    # weight (== the three fc layers), f32 accumulation, f32 bias + ReLU.
    h = jnp.dot(x_ref[...], wbd_ref[...],
                preferred_element_type=jnp.float32, precision=precision)
    h = jnp.maximum(h + bcat_ref[...], 0.0)

    if lane_dense_out:
        # Final (48 -> 1) projection as (1,48) x (tb,48)^T -> (1, tb): the
        # batch lands on lanes so the store is one dense, unmasked row.
        out_row = jax.lax.dot_general(
            w4_ref[...], h,
            dimension_numbers=(((1,), (1,)), ((), ())),
            preferred_element_type=jnp.float32, precision=precision)
        out_ref[...] = (out_row + b4_ref[0]).astype(out_ref.dtype)
    else:
        # Fallback: VPU multiply + lane reduction -> (tb, 1) column output.
        acc = jnp.sum(h * w4_ref[...], axis=-1, keepdims=True)
        out_ref[...] = (acc + b4_ref[0]).astype(out_ref.dtype)


def _build_lossnet_call(*, tb, grid, b_pad, dtype,
                        lane_dense_out, feat_buffers, high_precision):
    feat_kwargs = {}
    if feat_buffers is not None:
        feat_kwargs["pipeline_mode"] = pl.Buffered(feat_buffers)

    in_specs = [
        pl.BlockSpec((tb, PACKED_DIM), lambda i: (i, 0), **feat_kwargs),
        pl.BlockSpec((PACKED_DIM, HIDDEN_DIM), lambda i: (0, 0)),   # W (blockdiag)
        pl.BlockSpec((1, HIDDEN_DIM), lambda i: (0, 0)),            # fused bias
        pl.BlockSpec((1, HIDDEN_DIM), lambda i: (0, 0)),            # final weight
        pl.BlockSpec(memory_space=pltpu.MemorySpace.SMEM),          # final bias
    ]
    if lane_dense_out:
        out_shape = jax.ShapeDtypeStruct((1, b_pad), jnp.float32)
        out_specs = pl.BlockSpec((1, tb), lambda i: (0, i))
    else:
        out_shape = jax.ShapeDtypeStruct((b_pad, 1), jnp.float32)
        out_specs = pl.BlockSpec((tb, 1), lambda i: (i, 0))

    if high_precision and dtype == jnp.float32:
        precision = jax.lax.Precision.HIGHEST
    else:
        precision = jax.lax.Precision.DEFAULT

    kernel = functools.partial(_lossnet_kernel,
                               lane_dense_out=lane_dense_out,
                               precision=precision)

    itemsize = jnp.dtype(dtype).itemsize
    cost = pl.CostEstimate(
        flops=2 * b_pad * HIDDEN_DIM * (PACKED_DIM + 1),
        transcendentals=0,
        bytes_accessed=(b_pad * PACKED_DIM * itemsize        # packed features
                        + b_pad * 4                           # output row
                        + PACKED_DIM * HIDDEN_DIM * itemsize  # block-diag W
                        + 2 * HIDDEN_DIM * 4 + 4))            # biases + w4

    return pl.pallas_call(
        kernel,
        out_shape=out_shape,
        grid_spec=pltpu.PrefetchScalarGridSpec(
            num_scalar_prefetch=0,
            grid=(grid,),
            in_specs=in_specs,
            out_specs=out_specs),
        compiler_params=pltpu.CompilerParams(
            dimension_semantics=("parallel",)),
        cost_estimate=cost,
    )


# Preferred config first; later entries drop optional features so the kernel
# keeps running on jax/Mosaic builds that reject one of them.  The last entry
# is structurally identical to the previously-validated kernel.
_CONFIG_LADDER = (
    dict(lane_dense_out=True, feat_buffers=3, high_precision=True),
    dict(lane_dense_out=True, feat_buffers=None, high_precision=False),
    dict(lane_dense_out=False, feat_buffers=None, high_precision=False),
)


def pack_features(features):
    """cat([f1, f2, f3], axis=1) -> (B, 112).

    Ideally the upstream producer emits this packed buffer (optionally in
    bfloat16) directly; a standalone concatenate costs one extra HBM pass.
    """
    f1, f2, f3 = features
    return jnp.concatenate([f1, f2, f3], axis=1)


def lossnet_forward(features, params, *, batch_tile=8192):
    """LossNet forward.

    `features` is either the packed (B, 112) buffer (preferred) or the
    module's list of three (B, 64/32/16) arrays.  Returns (B, 1) float32.
    """
    x = pack_features(features) if isinstance(features, (list, tuple)) else features
    B, packed_dim = x.shape
    assert packed_dim == PACKED_DIM, packed_dim
    (w1, b1), (w2, b2), (w3, b3), (w4, b4) = params
    f32 = jnp.float32

    # Block-diagonal hidden weight (off-block entries are exact zeros, so one
    # matmul reproduces the three separate fc layers).  Cast to the feature
    # dtype so bf16 inputs get a bf16 x bf16 MXU matmul (f32 accumulation).
    w_bd = jnp.zeros((PACKED_DIM, HIDDEN_DIM), f32)
    w_bd = w_bd.at[0:64, 0:16].set(w1.astype(f32))
    w_bd = w_bd.at[64:96, 16:32].set(w2.astype(f32))
    w_bd = w_bd.at[96:112, 32:48].set(w3.astype(f32))
    w_bd = w_bd.astype(x.dtype)
    b_cat = jnp.concatenate([b1, b2, b3]).reshape(1, HIDDEN_DIM).astype(f32)
    w4_row = w4.reshape(1, HIDDEN_DIM).astype(f32)
    b4_s = b4.reshape(1).astype(f32)                 # scalar bias -> SMEM

    # Batch tile: multiple of 128 (lane-dense output row), big enough to
    # amortise per-grid-step overhead, clamped so the grid keeps >= 2 steps
    # for the two v7x TensorCores, preferring an even step count.
    tb = max(128, min(_round_up(batch_tile, 128),
                      _round_up(pl.cdiv(B, 2), 128)))
    grid = pl.cdiv(B, tb)
    if grid > 1 and grid % 2 == 1:
        tb2 = max(128, _round_up(pl.cdiv(B, grid + 1), 128))
        if pl.cdiv(B, tb2) == grid + 1:   # even steps without fully padded tiles
            tb, grid = tb2, grid + 1
    b_pad = grid * tb
    if b_pad != B:
        x = jnp.pad(x, ((0, b_pad - B), (0, 0)))

    last_err = None
    for cfg in _CONFIG_LADDER:
        try:
            call = _build_lossnet_call(tb=tb, grid=grid, b_pad=b_pad,
                                       dtype=x.dtype, **cfg)
            out = jax.block_until_ready(call(x, w_bd, b_cat, w4_row, b4_s))
        except Exception as err:          # pragma: no cover - portability
            last_err = err
            continue
        if cfg["lane_dense_out"]:
            # (1, b_pad) lane-dense row -> (B, 1); padded tail rows hold
            # relu(b)-derived garbage and are sliced off here.
            return out.reshape(-1)[:B].reshape(B, 1)
        return out[:B]
    raise last_err


def init_params(key, interm_dim=INTERM_DIM):
    """nn.Linear-style init (U(+/- 1/sqrt(fan_in))); weights are (in, out)."""
    params = []
    dims = [(IN_DIMS[0], interm_dim), (IN_DIMS[1], interm_dim),
            (IN_DIMS[2], interm_dim), (3 * interm_dim, 1)]
    for fan_in, fan_out in dims:
        key, kw, kb = jax.random.split(key, 3)
        bound = 1.0 / (fan_in ** 0.5)
        w = jax.random.uniform(kw, (fan_in, fan_out), jnp.float32, -bound, bound)
        b = jax.random.uniform(kb, (fan_out,), jnp.float32, -bound, bound)
        params.append((w, b))
    return params


def lossnet_reference(features, params):
    """Pure-JAX reference matching the PyTorch forward exactly."""
    f1, f2, f3 = features
    (w1, b1), (w2, b2), (w3, b3), (w4, b4) = params
    x1 = jax.nn.relu(f1 @ w1 + b1)
    x2 = jax.nn.relu(f2 @ w2 + b2)
    x3 = jax.nn.relu(f3 @ w3 + b3)
    x = jnp.concatenate([x1, x2, x3], axis=1)
    return x @ w4 + b4


if __name__ == "__main__":
    key = jax.random.PRNGKey(0)
    key, kx, kp = jax.random.split(key, 3)

    # Small demo shapes.  B deliberately not a multiple of the tile so the
    # padding / multi-step-grid paths are exercised.
    B = 300
    packed = jax.random.normal(kx, (B, PACKED_DIM), jnp.float32)
    features = [packed[:, :64], packed[:, 64:96], packed[:, 96:112]]
    params = init_params(kp)

    ref = lossnet_reference(features, params)

    # 1) float32, packed producer buffer, default tile (2 grid steps here).
    out = jax.block_until_ready(lossnet_forward(packed, params))
    assert out.shape == (B, 1), out.shape
    assert jnp.allclose(out, ref, atol=2e-4, rtol=2e-4)

    # 2) float32, list-of-features API, small tile -> multi-step grid with a
    #    padded tail tile.
    out_small = jax.block_until_ready(
        lossnet_forward(features, params, batch_tile=128))
    assert jnp.allclose(out_small, ref, atol=2e-4, rtol=2e-4)

    # 3) bfloat16 packed features (producer-side cast): half the HBM reads.
    out_bf16 = jax.block_until_ready(
        lossnet_forward(packed.astype(jnp.bfloat16), params))
    assert jnp.allclose(out_bf16, ref, atol=2e-2, rtol=2e-2)

    print("KERNEL_OK")
</pallas_src>

<mosaic_0001>
module attributes {stable_mosaic.version = 11 : i64} {
  func.func @_lossnet_kernel(%arg0: i32, %arg1: memref<256x112xf32, #tpu.memory_space<vmem>>, %arg2: memref<112x48xf32, #tpu.memory_space<vmem>>, %arg3: memref<1x48xf32, #tpu.memory_space<vmem>>, %arg4: memref<1x48xf32, #tpu.memory_space<vmem>>, %arg5: memref<1xf32, #tpu.memory_space<smem>>, %arg6: memref<1x256xf32, #tpu.memory_space<vmem>>) attributes {dimension_semantics = [#tpu.dimension_semantics<parallel>], iteration_bounds = array<i64: 2>, scalar_prefetch = 0 : i64, scratch_operands = 0 : i64, tpu.core_type = #tpu.core_type<tc>, window_params = [{transform_indices = @transform_0, window_bounds = array<i64: 256, 112>}, {pipeline_mode = #tpu.pipeline_mode<synchronous>, transform_indices = @transform_1, window_bounds = array<i64: 112, 48>}, {pipeline_mode = #tpu.pipeline_mode<synchronous>, transform_indices = @transform_2, window_bounds = array<i64: 1, 48>}, {pipeline_mode = #tpu.pipeline_mode<synchronous>, transform_indices = @transform_3, window_bounds = array<i64: 1, 48>}, {transform_indices = @transform_4, window_bounds = array<i64: 1>}, {transform_indices = @transform_5, window_bounds = array<i64: 1, 256>}]} {
    %c0 = arith.constant 0 : index
    %c0_0 = arith.constant 0 : index
    %0 = vector.load %arg1[%c0, %c0_0] : memref<256x112xf32, #tpu.memory_space<vmem>>, vector<256x112xf32>
    %c0_1 = arith.constant 0 : index
    %c0_2 = arith.constant 0 : index
    %1 = vector.load %arg2[%c0_1, %c0_2] : memref<112x48xf32, #tpu.memory_space<vmem>>, vector<112x48xf32>
    %cst = arith.constant dense<0.000000e+00> : vector<256x48xf32>
    %2 = tpu.matmul %0, %1, %cst {dimension_numbers = #tpu.dot_dimension_numbers<[1], [0], [0], [1], [0, 0, 1, 1], [], []>} : vector<256x112xf32>, vector<112x48xf32>, vector<256x48xf32> -> vector<256x48xf32>
    %c0_3 = arith.constant 0 : index
    %c0_4 = arith.constant 0 : index
    %3 = vector.load %arg3[%c0_3, %c0_4] : memref<1x48xf32, #tpu.memory_space<vmem>>, vector<1x48xf32>
    %4 = vector.broadcast %3 : vector<1x48xf32> to vector<256x48xf32>
    %5 = arith.addf %2, %4 : vector<256x48xf32>
    %cst_5 = arith.constant 0.000000e+00 : f32
    %6 = vector.broadcast %cst_5 : f32 to vector<256x48xf32>
    %7 = arith.maximumf %5, %6 : vector<256x48xf32>
    %c0_6 = arith.constant 0 : index
    %c0_7 = arith.constant 0 : index
    %8 = vector.load %arg4[%c0_6, %c0_7] : memref<1x48xf32, #tpu.memory_space<vmem>>, vector<1x48xf32>
    %cst_8 = arith.constant dense<0.000000e+00> : vector<1x256xf32>
    %9 = tpu.matmul %8, %7, %cst_8 {dimension_numbers = #tpu.dot_dimension_numbers<[1], [1], [0], [0], [0, 0, 1, 0], [], []>} : vector<1x48xf32>, vector<256x48xf32>, vector<1x256xf32> -> vector<1x256xf32>
    %c0_9 = arith.constant 0 : index
    %10 = memref.load %arg5[%c0_9] : memref<1xf32, #tpu.memory_space<smem>>
    %11 = vector.broadcast %10 : f32 to vector<1x256xf32>
    %12 = arith.addf %9, %11 : vector<1x256xf32>
    %c0_10 = arith.constant 0 : index
    %c0_11 = arith.constant 0 : index
    %13 = vector.load %arg6[%c0_10, %c0_11] : memref<1x256xf32, #tpu.memory_space<vmem>>, vector<1x256xf32>
    tpu.vector_store %arg6[%c0_10, %c0_11], %12 {strides = array<i32>} : memref<1x256xf32, #tpu.memory_space<vmem>>, vector<1x256xf32>,
    return
  }
  func.func @transform_0(%arg0: i32) -> (i32, i32) {
    %c0_i32 = arith.constant 0 : i32
    %c0_i32_0 = arith.constant 0 : i32
    return %arg0, %c0_i32 : i32, i32
  }
  func.func @transform_1(%arg0: i32) -> (i32, i32) {
    %c0_i32 = arith.constant 0 : i32
    %c0_i32_0 = arith.constant 0 : i32
    %c0_i32_1 = arith.constant 0 : i32
    return %c0_i32, %c0_i32_0 : i32, i32
  }
  func.func @transform_2(%arg0: i32) -> (i32, i32) {
    %c0_i32 = arith.constant 0 : i32
    %c0_i32_0 = arith.constant 0 : i32
    %c0_i32_1 = arith.constant 0 : i32
    return %c0_i32, %c0_i32_0 : i32, i32
  }
  func.func @transform_3(%arg0: i32) -> (i32, i32) {
    %c0_i32 = arith.constant 0 : i32
    %c0_i32_0 = arith.constant 0 : i32
    %c0_i32_1 = arith.constant 0 : i32
    return %c0_i32, %c0_i32_0 : i32, i32
  }
  func.func @transform_4(%arg0: i32) -> i32 {
    %c0_i32 = arith.constant 0 : i32
    %c0_i32_0 = arith.constant 0 : i32
    return %c0_i32 : i32
  }
  func.func @transform_5(%arg0: i32) -> (i32, i32) {
    %c0_i32 = arith.constant 0 : i32
    %c0_i32_0 = arith.constant 0 : i32
    return %c0_i32, %arg0 : i32, i32
  }
}

module attributes {stable_mosaic.version = 11 : i64} {
  func.func @_lossnet_kernel(%arg0: i32, %arg1: memref<256x112xf32, #tpu.memory_space<vmem>>, %arg2: memref<112x48xf32, #tpu.memory_space<vmem>>, %arg3: memref<1x48xf32, #tpu.memory_space<vmem>>, %arg4: memref<1x48xf32, #tpu.memory_space<vmem>>, %arg5: memref<1xf32, #tpu.memory_space<smem>>, %arg6: memref<256x1xf32, #tpu.memory_space<vmem>>) attributes {dimension_semantics = [#tpu.dimension_semantics<parallel>], iteration_bounds = array<i64: 2>, scalar_prefetch = 0 : i64, scratch_operands = 0 : i64, tpu.core_type = #tpu.core_type<tc>, window_params = [{transform_indices = @transform_0, window_bounds = array<i64: 256, 112>}, {pipeline_mode = #tpu.pipeline_mode<synchronous>, transform_indices = @transform_1, window_bounds = array<i64: 112, 48>}, {pipeline_mode = #tpu.pipeline_mode<synchronous>, transform_indices = @transform_2, window_bounds = array<i64: 1, 48>}, {pipeline_mode = #tpu.pipeline_mode<synchronous>, transform_indices = @transform_3, window_bounds = array<i64: 1, 48>}, {transform_indices = @transform_4, window_bounds = array<i64: 1>}, {transform_indices = @transform_5, window_bounds = array<i64: 256, 1>}]} {
    %c0 = arith.constant 0 : index
    %c0_0 = arith.constant 0 : index
    %0 = vector.load %arg1[%c0, %c0_0] : memref<256x112xf32, #tpu.memory_space<vmem>>, vector<256x112xf32>
    %c0_1 = arith.constant 0 : index
    %c0_2 = arith.constant 0 : index
    %1 = vector.load %arg2[%c0_1, %c0_2] : memref<112x48xf32, #tpu.memory_space<vmem>>, vector<112x48xf32>
    %cst = arith.constant dense<0.000000e+00> : vector<256x48xf32>
    %2 = tpu.matmul %0, %1, %cst {dimension_numbers = #tpu.dot_dimension_numbers<[1], [0], [0], [1], [0, 0, 1, 1], [], []>} : vector<256x112xf32>, vector<112x48xf32>, vector<256x48xf32> -> vector<256x48xf32>
    %c0_3 = arith.constant 0 : index
    %c0_4 = arith.constant 0 : index
    %3 = vector.load %arg3[%c0_3, %c0_4] : memref<1x48xf32, #tpu.memory_space<vmem>>, vector<1x48xf32>
    %4 = vector.broadcast %3 : vector<1x48xf32> to vector<256x48xf32>
    %5 = arith.addf %2, %4 : vector<256x48xf32>
    %cst_5 = arith.constant 0.000000e+00 : f32
    %6 = vector.broadcast %cst_5 : f32 to vector<256x48xf32>
    %7 = arith.maximumf %5, %6 : vector<256x48xf32>
    %c0_6 = arith.constant 0 : index
    %c0_7 = arith.constant 0 : index
    %8 = vector.load %arg4[%c0_6, %c0_7] : memref<1x48xf32, #tpu.memory_space<vmem>>, vector<1x48xf32>
    %9 = vector.broadcast %8 : vector<1x48xf32> to vector<256x48xf32>
    %10 = arith.mulf %7, %9 : vector<256x48xf32>
    %cst_8 = arith.constant dense<0.000000e+00> : vector<256xf32>
    %11 = vector.multi_reduction <add>, %10, %cst_8 [1] : vector<256x48xf32> to vector<256xf32>
    %12 = vector.shape_cast %11 : vector<256xf32> to vector<256x1xf32>
    %c0_9 = arith.constant 0 : index
    %13 = memref.load %arg5[%c0_9] : memref<1xf32, #tpu.memory_space<smem>>
    %14 = vector.broadcast %13 : f32 to vector<256x1xf32>
    %15 = arith.addf %12, %14 : vector<256x1xf32>
    %c0_10 = arith.constant 0 : index
    %c0_11 = arith.constant 0 : index
    %16 = vector.load %arg6[%c0_10, %c0_11] : memref<256x1xf32, #tpu.memory_space<vmem>>, vector<256x1xf32>
    tpu.vector_store %arg6[%c0_10, %c0_11], %15 {strides = array<i32>} : memref<256x1xf32, #tpu.memory_space<vmem>>, vector<256x1xf32>,
    return
  }
  func.func @transform_0(%arg0: i32) -> (i32, i32) {
    %c0_i32 = arith.constant 0 : i32
    %c0_i32_0 = arith.constant 0 : i32
    return %arg0, %c0_i32 : i32, i32
  }
  func.func @transform_1(%arg0: i32) -> (i32, i32) {
    %c0_i32 = arith.constant 0 : i32
    %c0_i32_0 = arith.constant 0 : i32
    %c0_i32_1 = arith.constant 0 : i32
    return %c0_i32, %c0_i32_0 : i32, i32
  }
  func.func @transform_2(%arg0: i32) -> (i32, i32) {
    %c0_i32 = arith.constant 0 : i32
    %c0_i32_0 = arith.constant 0 : i32
    %c0_i32_1 = arith.constant 0 : i32
    return %c0_i32, %c0_i32_0 : i32, i32
  }
  func.func @transform_3(%arg0: i32) -> (i32, i32) {
    %c0_i32 = arith.constant 0 : i32
    %c0_i32_0 = arith.constant 0 : i32
    %c0_i32_1 = arith.constant 0 : i32
    return %c0_i32, %c0_i32_0 : i32, i32
  }
  func.func @transform_4(%arg0: i32) -> i32 {
    %c0_i32 = arith.constant 0 : i32
    %c0_i32_0 = arith.constant 0 : i32
    return %c0_i32 : i32
  }
  func.func @transform_5(%arg0: i32) -> (i32, i32) {
    %c0_i32 = arith.constant 0 : i32
    %c0_i32_0 = arith.constant 0 : i32
    return %arg0, %c0_i32 : i32, i32
  }
}

</mosaic_0001>

<bundles_post_ra>
// kernel: tpu_custom_call.1
= control target key start
LH: loop header
LB: loop body
LE: loop exit
PB: predicated region body
PF: predicated region fallthrough
CT: control target
= control target key end

     0   :  { %s1594_s0 = inlined_call_operand.vmem [shape: f32[512,112], index: 0, kind: input, shape index: {}]   ;;  %s1595_s1 = inlined_call_operand.vmem [shape: f32[112,48], index: 1, kind: input, shape index: {}]   ;;  %s1596_s2 = inlined_call_operand.vmem [shape: f32[1,48], index: 2, kind: input, shape index: {}]   ;;  %s1597_s3 = inlined_call_operand.vmem [shape: f32[1,48], index: 3, kind: input, shape index: {}]   ;;  %s1598_s4 = inlined_call_operand.<no memory space> [shape: f32[1], index: 4, kind: input, shape index: {}]   ;;  %s1599_s5 = inlined_call_operand.hbm [shape: f32[1,512], index: 5, kind: output, shape index: {}]  }
   0x1   :  { %10 = sst [smem:[#allocation2]] %s1598_s4 }
   0x2   :  { %11 = vsyncpa [#allocation4], 0 }
   0x3   :  { %13 = vsyncpa [#allocation4 + $0x1], 0  ;;  %s1277_s20 = smov 0   ;;  %s1279_s21 = smov 0  }
   0x4   :  { %s1281_s22 = smov 0   ;;  %s1283_s23 = smov 0  }
   0x5 LB: > { %s904_s4 = sadd.s32 4294967295, %s1240_s23   ;;  %s905_s24 = sadd.s32 4294967294, %s1240_s23   ;;  %s1240_s23 = sphi %s1283_s23, %s1605_s23   ;;  %s1236_s22 = sphi %s1281_s22, %s1604_s22   ;;  %s1232_s21 = sphi %s1279_s21, %s1603_s21   ;;  %s1228_s20 = sphi %s1277_s20, %s1602_s20  }
   0x6   : > { %s1300_s25 = sadd.s32 1, %s1240_s23   ;;  %s136_s26 = sadd.s32 1, %s1236_s22 }
   0x7   : > { %s133_s27 = ssub.s32 %s1240_s23, %s1300_s25  ;;  %p146_p0 = scmp.ne.s32.totalorder %s1236_s22, %s1232_s21 }
   0x8   : > { %p134_p1 = scmp.eq.s32.totalorder %s133_s27, 0  ;;  %p147_p2 = scmp.eq.s32.totalorder %s904_s4, 1 }
   0x9   : > { %p152_p3 = scmp.ne.s32.totalorder %s1232_s21, %s1228_s20  ;;  %p153_p4 = scmp.eq.s32.totalorder %s905_s24, 1 }
   0xa   : > { %s1310_s28 = scalar_select %p134_p1, %s1236_s22, %s136_s26  }
   0xb   : > { %p1312_p5 = por %p147_p2, %p146_p0  ;;  %p1316_p6 = por %p153_p4, %p152_p3 }
   0xc   : > { %p908_p7 = scmp.ge.s32.totalorder %s1240_s23, 1  ;;  %p192_p8 = scmp.lt.s32.totalorder %s1240_s23, 3 }
   0xe   : > { %p193_p9 = pnand %p908_p7, %p192_p8 }
   0xf   : > { %s1328_s10 = sshll.u32 (!%p193_p9), %s904_s4, 5  ;;  %s635_s9 = sld [smem:[#allocation2]] (!%p193_p9) }
  0x10   : > { %196 = sbr.rel (%p193_p9) target bundleno = 587 (0x24b), region = 40  ;;  %p221_p10 = scmp.lt.s32.totalorder (!%p193_p9), %s1328_s10, 63 }
  0x11   : > { %s217_s11 = sand.u32 (!%p193_p9), 1, %s1232_s21   ;;  %s844_s17 = scalar_lea.hbm (!%p193_p9), %s1599_s5, %s1328_s10 }
  0x12   : > { %s909_s12 = sshll.u32 (!%p193_p9), %s217_s11, 1  ;;  %s832_s18 = scalar_lea.sflag (!%p193_p9), [#allocation4], %s217_s11 }
  0x13   : > { %s1243_s4 = smov (!%p193_p9), [#allocation3]  }
  0x14   : > { %s1184_s26 = sshll.u32 (!%p193_p9), %s1243_s4, 4  ;;  %s1185_s26 = int_to_ptr.vmem [resolvable:$false] %s1184_s26 }
  0x15   : > { %v272_v0 = vld [vmem:[%s1595_s1 + $0x68] sm:$0xff]  ;;  %v271_v1 = vld [vmem:[%s1595_s1 + $0x60] sm:$0xff]  ;;  %v270_v2 = vld [vmem:[%s1595_s1 + $0x58] sm:$0xff]  ;;  %s222_s13 = scalar_select %p221_p10, %s1328_s10, 63  ;;  %vm280_vm0 = vcmask 916480   ;;  %vm637_vm1 = vcmask 392192  }
  0x16   : > { %1064 = vmatprep.subr.mxu0 %v272_v0  ;;  %v269_v3 = vld [vmem:[%s1595_s1 + $0x50] sm:$0xff]  ;;  %v268_v4 = vld [vmem:[%s1595_s1 + $0x48] sm:$0xff]  ;;  %v267_v6 = vld [vmem:[%s1595_s1 + $0x40] sm:$0xff]  ;;  %s1186_s27 = scalar_lea.vmem %s1185_s26, 64 }
  0x17   : > { %1065 = vmatpush3.msra.mxu0 %v272_v0  ;;  %s911_s16 = sshll.u32 %s222_s13, 3  ;;  %v266_v7 = vld [vmem:[%s1595_s1 + $0x38] sm:$0xff]  ;;  %v265_v8 = vld [vmem:[%s1595_s1 + $0x30] sm:$0xff]  ;;  %v264_v9 = vld [vmem:[%s1595_s1 + $0x28] sm:$0xff]  ;;  %s219_s13 = scalar_lea.vmem [#allocation3], %s909_s12 }
  0x18   : > { %1066 = vmatprep.subr.mxu0 %v271_v1  ;;  %s1344_s24 = scalar_lea.vmem %s1594_s0, %s911_s16  ;;  %v263_v10 = vld [vmem:[%s1595_s1 + $0x20] sm:$0xff]  ;;  %v262_v11 = vld [vmem:[%s1595_s1 + $0x18] sm:$0xff]  ;;  %v261_v12 = vld [vmem:[%s1595_s1 + $0x10] sm:$0xff]  ;;  %s846_s14 = sshll.u32 %s219_s13, 4  ;;  %s847_s14 = int_to_ptr.vmem [resolvable:$true] %s846_s14 }
  0x19   : > { %1067 = vmatpush3.msra.mxu0 %v271_v1  ;;  %v227_v5 = vld [vmem:[%s1344_s24] sm:$0xff]  ;;  %v260_v13 = vld [vmem:[%s1595_s1 + $0x8] sm:$0xff]  ;;  %v229_v16 = vld [vmem:[%s1344_s24 + $0x10] sm:$0xff]  ;;  %s1180_s19 = scalar_lea.vmem %s847_s14, 32  ;;  %p1187_p0 = scmp.lt.s32.totalorder %s847_s14, %s1185_s26 }
  0x1a   : > { %1068 = vmatprep.subr.mxu0 %v270_v2  ;;  %1092 = vmatprep.mubr.msk.f32.mxu0 %vm280_vm0, %v227_v5  ;;  %v259_v14 = vld [vmem:[%s1595_s1] sm:$0xff]  ;;  %v228_v15 = vld [vmem:[%s1344_s24 + $0x8] sm:$0xff]  ;;  %v230_v17 = vld [vmem:[%s1344_s24 + $0x18] sm:$0xff]  ;;  %p1181_p11 = scmp.ne.s32.totalorder %s847_s14, %s1180_s19  ;;  %p1188_p1 = scmp.lt.s32.totalorder %s1186_s27, %s1180_s19 }
  0x1b   : > { %1069 = vmatpush3.msra.mxu0 %v270_v2  ;;  %v231_v18 = vld [vmem:[%s1344_s24 + $0x20] sm:$0xff]  ;;  %v232_v19 = vld [vmem:[%s1344_s24 + $0x28] sm:$0xff]  ;;  %v233_v20 = vld [vmem:[%s1344_s24 + $0x30] sm:$0xff] }
  0x1c   : > { %1070 = vmatprep.subr.mxu0 %v269_v3  ;;  %v234_v21 = vld [vmem:[%s1344_s24 + $0x38] sm:$0xff]  ;;  %v235_v22 = vld [vmem:[%s1344_s24 + $0x40] sm:$0xff]  ;;  %v236_v23 = vld [vmem:[%s1344_s24 + $0x48] sm:$0xff]  ;;  %p1182_p12 = pnand %p1181_p11, %p1312_p5  ;;  %p1189_p2 = por %p1188_p1, %p1187_p0 }
  0x1d   : > { %1071 = vmatpush3.msra.mxu0 %v269_v3  ;;  %v237_v24 = vld [vmem:[%s1344_s24 + $0x50] sm:$0xff]  ;;  %v238_v25 = vld [vmem:[%s1344_s24 + $0x58] sm:$0xff]  ;;  %v239_v26 = vld [vmem:[%s1344_s24 + $0x60] sm:$0xff] }
  0x1e   : > { %1072 = vmatprep.subr.mxu0 %v268_v4  ;;  %v240_v27 = vld [vmem:[%s1344_s24 + $0x68] sm:$0xff]  ;;  %v241_v28 = vld [vmem:[%s1344_s24 + $0x70] sm:$0xff]  ;;  %v242_v29 = vld [vmem:[%s1344_s24 + $0x78] sm:$0xff]  ;;  %p1183_p13 = pneg %p1182_p12 }
  0x1f   : > { %1073 = vmatpush3.msra.mxu0 %v268_v4  ;;  %v243_v30 = vld [vmem:[%s1344_s24 + $0x80] sm:$0xff]  ;;  %v244_v31 = vld [vmem:[%s1344_s24 + $0x88] sm:$0xff]  ;;  %v245_v32 = vld [vmem:[%s1344_s24 + $0x90] sm:$0xff] }
  0x20   : > { %1074 = vmatprep.subr.mxu0 %v267_v6  ;;  %v246_v33 = vld [vmem:[%s1344_s24 + $0x98] sm:$0xff]  ;;  %v247_v34 = vld [vmem:[%s1344_s24 + $0xa0] sm:$0xff]  ;;  %v248_v35 = vld [vmem:[%s1344_s24 + $0xa8] sm:$0xff]  ;;  %p1190_p3 = pnand %p1189_p2, %p1183_p13 }
  0x21   : > { %1075 = vmatpush3.msra.mxu0 %v267_v6  ;;  %v249_v36 = vld [vmem:[%s1344_s24 + $0xb0] sm:$0xff]  ;;  %v250_v37 = vld [vmem:[%s1344_s24 + $0xb8] sm:$0xff]  ;;  %v251_v38 = vld [vmem:[%s1344_s24 + $0xc0] sm:$0xff] }
  0x22   : > { %1076 = vmatprep.subr.mxu0 %v266_v7  ;;  %v252_v39 = vld [vmem:[%s1344_s24 + $0xc8] sm:$0xff]  ;;  %v253_v40 = vld [vmem:[%s1344_s24 + $0xd0] sm:$0xff]  ;;  %v254_v41 = vld [vmem:[%s1344_s24 + $0xd8] sm:$0xff] }
  0x23   : > { %1077 = vmatpush3.msra.mxu0 %v266_v7  ;;  %v255_v42 = vld [vmem:[%s1344_s24 + $0xe0] sm:$0xff]  ;;  %v256_v43 = vld [vmem:[%s1344_s24 + $0xe8] sm:$0xff]  ;;  %v257_v44 = vld [vmem:[%s1344_s24 + $0xf0] sm:$0xff] }
  0x24   : > { %1078 = vmatprep.subr.mxu0 %v265_v8  ;;  %v258_v45 = vld [vmem:[%s1344_s24 + $0xf8] sm:$0xff]  ;;  %v1440_v46 = vld [vmem:[%s1597_s3] sm:$0x1] }
  0x25   : > { %1079 = vmatpush3.msra.mxu0 %v265_v8  ;;  %1062 = vmatprep.mubr.msk.f32.mxu1 %vm637_vm1, %v1440_v46 }
  0x26   : > { %1080 = vmatprep.subr.mxu0 %v264_v9 }
  0x27   : > { %1081 = vmatpush3.msra.mxu0 %v264_v9 }
  0x28   : > { %1082 = vmatprep.subr.mxu0 %v263_v10 }
  0x29   : > { %1083 = vmatpush3.msra.mxu0 %v263_v10 }
  0x2a   : > { %1084 = vmatprep.subr.mxu0 %v262_v11 }
  0x2b   : > { %1085 = vmatpush3.msra.mxu0 %v262_v11 }
  0x2c   : > { %1086 = vmatprep.subr.mxu0 %v261_v12 }
  0x2d   : > { %1087 = vmatpush3.msra.mxu0 %v261_v12 }
  0x2e   : > { %1088 = vmatprep.subr.mxu0 %v260_v13 }
  0x2f   : > { %1089 = vmatpush3.msra.mxu0 %v260_v13  ;;  %v1477_v13 = vld [vmem:[%s1596_s2] ss:$0 sm:$0xff] }
  0x30   : > { %1090 = vmatprep.subr.mxu0 %v259_v14 }
  0x31   : > { %1091 = vmatpush3.msra.mxu0 %v259_v14 }
  0x32   : > { %1093 = vmatmul.mubr.msk.f32.vlgmr.msra.gmra.mxu0 %vm280_vm0, %v228_v15 }
  0x33   : > { %1095 = vmatprep.mubr.msk.f32.mxu0 %vm280_vm0, %v229_v16 }
  0x36   : > { %1096 = vmatmul.mubr.msk.f32.gmra.mxu0 %vm280_vm0, %v230_v17 }
  0x37   : > { %1098 = vmatprep.mubr.msk.f32.mxu0 %vm280_vm0, %v231_v18 }
  0x3a   : > { %1099 = vmatmul.mubr.msk.f32.gmra.mxu0 %vm280_vm0, %v232_v19 }
  0x3b   : > { %1101 = vmatprep.mubr.msk.f32.mxu0 %vm280_vm0, %v233_v20 }
  0x3e   : > { %1102 = vmatmul.mubr.msk.f32.gmra.mxu0 %vm280_vm0, %v234_v21 }
  0x3f   : > { %1104 = vmatprep.mubr.msk.f32.mxu0 %vm280_vm0, %v235_v22 }
  0x42   : > { %1105 = vmatmul.mubr.msk.f32.gmra.mxu0 %vm280_vm0, %v236_v23 }
  0x43   : > { %1107 = vmatprep.mubr.msk.f32.mxu0 %vm280_vm0, %v237_v24 }
  0x46   : > { %1108 = vmatmul.mubr.msk.f32.gmra.mxu0 %vm280_vm0, %v238_v25 }
  0x47   : > { %1110 = vmatprep.mubr.msk.f32.mxu0 %vm280_vm0, %v239_v26 }
  0x4a   : > { %1111 = vmatmul.mubr.msk.f32.gmra.mxu0 %vm280_vm0, %v240_v27 }
  0x4b   : > { %1113 = vmatprep.mubr.msk.f32.mxu0 %vm280_vm0, %v241_v28 }
  0x4e   : > { %1114 = vmatmul.mubr.msk.f32.gmra.mxu0 %vm280_vm0, %v242_v29 }
  0x4f   : > { %1116 = vmatprep.mubr.msk.f32.mxu0 %vm280_vm0, %v243_v30 }
  0x52   : > { %1117 = vmatmul.mubr.msk.f32.gmra.mxu0 %vm280_vm0, %v244_v31 }
  0x53   : > { %1119 = vmatprep.mubr.msk.f32.mxu0 %vm280_vm0, %v245_v32 }
  0x56   : > { %1120 = vmatmul.mubr.msk.f32.gmra.mxu0 %vm280_vm0, %v246_v33 }
  0x57   : > { %1122 = vmatprep.mubr.msk.f32.mxu0 %vm280_vm0, %v247_v34 }
  0x5a   : > { %1123 = vmatmul.mubr.msk.f32.gmra.mxu0 %vm280_vm0, %v248_v35 }
  0x5b   : > { %1125 = vmatprep.mubr.msk.f32.mxu0 %vm280_vm0, %v249_v36 }
  0x5e   : > { %1126 = vmatmul.mubr.msk.f32.gmra.mxu0 %vm280_vm0, %v250_v37 }
  0x5f   : > { %1128 = vmatprep.mubr.msk.f32.mxu0 %vm280_vm0, %v251_v38 }
  0x62   : > { %1129 = vmatmul.mubr.msk.f32.gmra.mxu0 %vm280_vm0, %v252_v39 }
  0x63   : > { %1131 = vmatprep.mubr.msk.f32.mxu0 %vm280_vm0, %v253_v40 }
  0x66   : > { %1132 = vmatmul.mubr.msk.f32.gmra.mxu0 %vm280_vm0, %v254_v41 }
  0x67   : > { %1134 = vmatprep.mubr.msk.f32.mxu0 %vm280_vm0, %v255_v42 }
  0x6a   : > { %1135 = vmatmul.mubr.msk.f32.gmra.mxu0 %vm280_vm0, %v256_v43 }
  0x6b   : > { %1137 = vmatprep.mubr.msk.f32.mxu0 %vm280_vm0, %v257_v44 }
  0x6e   : > { %1138 = vmatmul.mubr.msk.f32.gmra.mxu0 %vm280_vm0, %v258_v45 }
  0xf2   : > { %v1444_v47 = vpop.f32.mrf.mxu0 }
  0xf4   : > { %v1446_v48 = vpop.f32.mrf.mxu0 }
  0xf6   : > { %v1448_v49 = vpop.f32.mrf.mxu0 }
  0xf8   : > { %v1450_v50 = vpop.f32.mrf.mxu0 }
  0xfa   : > { %v1452_v51 = vpop.f32.mrf.mxu0 }
  0xfc   : > { %v1454_v52 = vpop.f32.mrf.mxu0 }
  0xfe   : > { %v1456_v53 = vpop.f32.mrf.mxu0 }
 0x100   : > { %v1458_v54 = vpop.f32.mrf.mxu0 }
 0x102   : > { %v1106_v55 = vpop.f32.mrf.mxu0 }
 0x103   : > { %v489_v40 = vadd.f32 %v1106_v55, %v1477_v13  ;;  %v479_v55 = vadd.f32 %v1456_v53, %v1477_v13  ;;  %v469_v53 = vadd.f32 %v1452_v51, %v1477_v13  ;;  %v459_v51 = vadd.f32 %v1448_v49, %v1477_v13 }
 0x104   : > { %v1460_v56 = vpop.f32.mrf.mxu0  ;;  %v449_v49 = vadd.f32 %v1444_v47, %v1477_v13 }
 0x105   : > { %v611_v44 = vmax.f32 %v489_v40, 0.0  ;;  %v484_v45 = vadd.f32 %v1477_v13, %v1460_v56  ;;  %v474_v56 = vadd.f32 %v1477_v13, %v1458_v54  ;;  %v607_v54 = vmax.f32 %v469_v53, 0.0 }
 0x106   : > { %v1109_v57 = vpop.f32.mrf.mxu0 }
 0x107   : > { %v499_v32 = vadd.f32 %v1109_v57, %v1477_v13 }
 0x108   : > { %v493_v58 = vpop.f32.mrf.mxu0 }
 0x109   : > { %v613_v36 = vmax.f32 %v499_v32, 0.0  ;;  %v494_v37 = vadd.f32 %v1477_v13, %v493_v58 }
 0x10a   : > { %v1112_v59 = vpop.f32.mrf.mxu0 }
 0x10b   : > { %v509_v24 = vadd.f32 %v1112_v59, %v1477_v13  ;;  %v612_v41 = vmax.f32 %v494_v37, 0.0  ;;  %v610_v59 = vmax.f32 %v484_v45, 0.0 }
 0x10c   : > { %v503_v60 = vpop.f32.mrf.mxu0 }
 0x10d   : > { %v615_v28 = vmax.f32 %v509_v24, 0.0  ;;  %v504_v29 = vadd.f32 %v1477_v13, %v503_v60 }
 0x10e   : > { %v1115_v61 = vpop.f32.mrf.mxu0 }
 0x10f   : > { %v519_v14 = vadd.f32 %v1115_v61, %v1477_v13  ;;  %v614_v33 = vmax.f32 %v504_v29, 0.0 }
 0x110   : > { %v513_v62 = vpop.f32.mrf.mxu0 }
 0x111   : > { %v617_v20 = vmax.f32 %v519_v14, 0.0  ;;  %v514_v21 = vadd.f32 %v1477_v13, %v513_v62  ;;  %v609_v62 = vmax.f32 %v479_v55, 0.0 }
 0x112   : > { %v1462_v63 = vpop.f32.mrf.mxu0 }
 0x113   : > { %v616_v25 = vmax.f32 %v514_v21, 0.0  ;;  %v814_v21 = vlaneseq }
 0x114   : > { %v1464_v0 = vpop.f32.mrf.mxu0 }
 0x115   : > { %vm828_vm2 = vcmp.lt.s32.totalorder %v814_v21, 256 }
 0x116   : > { %v1466_v1 = vpop.f32.mrf.mxu0 }
 0x118   : > { %v1468_v2 = vpop.f32.mrf.mxu0 }
 0x119   : > { %v534_v14 = vadd.f32 %v1477_v13, %v1468_v2 }
 0x11a   : > { %v1470_v3 = vpop.f32.mrf.mxu0 }
 0x11c   : > { %v1472_v4 = vpop.f32.mrf.mxu0 }
 0x11e   : > { %v1127_v5 = vpop.f32.mrf.mxu0 }
 0x11f   : > { %v559_v57 = vadd.f32 %v1127_v5, %v1477_v13  ;;  %v549_v5 = vadd.f32 %v1470_v3, %v1477_v13  ;;  %v464_v3 = vadd.f32 %v1477_v13, %v1454_v52  ;;  %v605_v52 = vmax.f32 %v459_v51, 0.0 }
 0x120   : > { %v553_v6 = vpop.f32.mrf.mxu0 }
 0x121   : > { %v625_v60 = vmax.f32 %v559_v57, 0.0  ;;  %v554_v61 = vadd.f32 %v1477_v13, %v553_v6  ;;  %v608_v6 = vmax.f32 %v474_v56, 0.0 }
 0x122   : > { %v1130_v7 = vpop.f32.mrf.mxu0 }
 0x123   : > { %v569_v38 = vadd.f32 %v1130_v7, %v1477_v13  ;;  %v624_v7 = vmax.f32 %v554_v61, 0.0 }
 0x124   : > { %v563_v8 = vpop.f32.mrf.mxu0 }
 0x125   : > { %v627_v42 = vmax.f32 %v569_v38, 0.0  ;;  %v564_v43 = vadd.f32 %v1477_v13, %v563_v8  ;;  %v623_v8 = vmax.f32 %v549_v5, 0.0 }
 0x126   : > { %v1133_v9 = vpop.f32.mrf.mxu0 }
 0x127   : > { %v579_v30 = vadd.f32 %v1133_v9, %v1477_v13  ;;  %v626_v58 = vmax.f32 %v564_v43, 0.0  ;;  %v544_v9 = vadd.f32 %v1477_v13, %v1472_v4  ;;  %v606_v4 = vmax.f32 %v464_v3, 0.0 }
 0x128   : > { %v573_v10 = vpop.f32.mrf.mxu0 }
 0x129   : > { %v629_v34 = vmax.f32 %v579_v30, 0.0  ;;  %v574_v35 = vadd.f32 %v1477_v13, %v573_v10  ;;  %v539_v10 = vadd.f32 %v1466_v1, %v1477_v13  ;;  %v454_v1 = vadd.f32 %v1477_v13, %v1450_v50 }
 0x12a   : > { %v1136_v11 = vpop.f32.mrf.mxu0  ;;  %v603_v50 = vmax.f32 %v449_v49, 0.0 }
 0x12b   : > { %v589_v22 = vadd.f32 %v1136_v11, %v1477_v13  ;;  %v628_v39 = vmax.f32 %v574_v35, 0.0  ;;  %v622_v11 = vmax.f32 %v544_v9, 0.0  ;;  %v604_v2 = vmax.f32 %v454_v1, 0.0 }
 0x12c   : > { %v583_v12 = vpop.f32.mrf.mxu0 }
 0x12d   : > { %v631_v26 = vmax.f32 %v589_v22, 0.0  ;;  %v584_v27 = vadd.f32 %v1477_v13, %v583_v12  ;;  %v621_v12 = vmax.f32 %v539_v10, 0.0 }
 0x12e   : > { %v1139_v15 = vpop.f32.mrf.mxu0 }
 0x12f   : > { %v599_v16 = vadd.f32 %v1139_v15, %v1477_v13  ;;  %v630_v31 = vmax.f32 %v584_v27, 0.0  ;;  %v529_v15 = vadd.f32 %v1462_v63, %v1477_v13  ;;  %v444_v63 = vadd.f32 %v1477_v13, %v1446_v48 }
 0x130   : > { %v593_v17 = vpop.f32.mrf.mxu0  ;;  %v636_v48 = vstv %s635_s9 }
 0x131   : > { %v633_v18 = vmax.f32 %v599_v16, 0.0  ;;  %v594_v19 = vadd.f32 %v1477_v13, %v593_v17  ;;  %v620_v16 = vmax.f32 %v534_v14, 0.0  ;;  %v619_v17 = vmax.f32 %v529_v15, 0.0 }
 0x132   : > { %v602_v47 = vmax.f32 %v444_v63, 0.0 }
 0x133   : > { %v632_v23 = vmax.f32 %v594_v19, 0.0  ;;  %1030 = vmatprep.subr.msk.mxu1 %vm637_vm1, %v633_v18  ;;  %v524_v18 = vadd.f32 %v1477_v13, %v1464_v0  ;;  %v1242_v0 = vmov 1966171168  }
 0x134   : > { %1031 = vmatpush3.xpose.msk.msra.mxu1 %vm637_vm1, %v617_v20  ;;  %v812_v20 = vunpack.c.l.s4 %v1242_v0 }
 0x135   : > { %1032 = vmatprep.subr.msk.mxu1 %vm637_vm1, %v632_v23  ;;  %v618_v19 = vmax.f32 %v524_v18, 0.0  ;;  %v815_v23 = vshrl.u32 %v814_v21, 7 }
 0x136   : > { %v813_v22 = vunpack.c.0.s8 %v812_v20 }
 0x138   : > { %1033 = vmatpush3.xpose.msk.msra.mxu1 %vm637_vm1, %v616_v25  ;;  %v816_v27 = vsub.s32 %v813_v22, %v815_v23 }
 0x139   : > { %1034 = vmatprep.subr.msk.mxu1 %vm637_vm1, %v631_v26 }
 0x13c   : > { %1035 = vmatpush3.xpose.msk.msra.mxu1 %vm637_vm1, %v615_v28 }
 0x13d   : > { %1036 = vmatprep.subr.msk.mxu1 %vm637_vm1, %v630_v31 }
 0x140   : > { %1037 = vmatpush3.xpose.msk.msra.mxu1 %vm637_vm1, %v614_v33 }
 0x141   : > { %1038 = vmatprep.subr.msk.mxu1 %vm637_vm1, %v629_v34 }
 0x144   : > { %1039 = vmatpush3.xpose.msk.msra.mxu1 %vm637_vm1, %v613_v36 }
 0x145   : > { %1040 = vmatprep.subr.msk.mxu1 %vm637_vm1, %v628_v39 }
 0x148   : > { %1041 = vmatpush3.xpose.msk.msra.mxu1 %vm637_vm1, %v612_v41 }
 0x149   : > { %1042 = vmatprep.subr.msk.mxu1 %vm637_vm1, %v627_v42 }
 0x14c   : > { %1043 = vmatpush3.xpose.msk.msra.mxu1 %vm637_vm1, %v611_v44 }
 0x14d   : > { %1044 = vmatprep.subr.msk.mxu1 %vm637_vm1, %v626_v58 }
 0x150   : > { %1045 = vmatpush3.xpose.msk.msra.mxu1 %vm637_vm1, %v610_v59 }
 0x151   : > { %1046 = vmatprep.subr.msk.mxu1 %vm637_vm1, %v625_v60 }
 0x154   : > { %1047 = vmatpush3.xpose.msk.msra.mxu1 %vm637_vm1, %v609_v62 }
 0x155   : > { %1048 = vmatprep.subr.msk.mxu1 %vm637_vm1, %v624_v7 }
 0x158   : > { %1049 = vmatpush3.xpose.msk.msra.mxu1 %vm637_vm1, %v608_v6 }
 0x159   : > { %1050 = vmatprep.subr.msk.mxu1 %vm637_vm1, %v623_v8 }
 0x15c   : > { %1051 = vmatpush3.xpose.msk.msra.mxu1 %vm637_vm1, %v607_v54 }
 0x15d   : > { %1052 = vmatprep.subr.msk.mxu1 %vm637_vm1, %v622_v11 }
 0x160   : > { %1053 = vmatpush3.xpose.msk.msra.mxu1 %vm637_vm1, %v606_v4 }
 0x161   : > { %1054 = vmatprep.subr.msk.mxu1 %vm637_vm1, %v621_v12 }
 0x164   : > { %1055 = vmatpush3.xpose.msk.msra.mxu1 %vm637_vm1, %v605_v52 }
 0x165   : > { %1056 = vmatprep.subr.msk.mxu1 %vm637_vm1, %v620_v16 }
 0x168   : > { %1057 = vmatpush3.xpose.msk.msra.mxu1 %vm637_vm1, %v604_v2 }
 0x169   : > { %1058 = vmatprep.subr.msk.mxu1 %vm637_vm1, %v619_v17 }
 0x16c   : > { %1059 = vmatpush3.xpose.msk.msra.mxu1 %vm637_vm1, %v603_v50 }
 0x16d   : > { %1060 = vmatprep.subr.msk.mxu1 %vm637_vm1, %v618_v19 }
 0x170   : > { %1061 = vmatpush3.xpose.msk.msra.mxu1 %vm637_vm1, %v602_v47 }
 0x173   : > { %1063 = vmatmul.mubr.msk.f32.vlgmr.msra.gmra.mxu1 %vm637_vm1, %v1440_v46 }
 0x233   : > { %v803_v13 = vpop.f32.mrf.mxu1 }
 0x234   : > { %v804_v25 = vadd.f32 %v803_v13, %v636_v48 }
 0x235   : > { %v805_v24 = vpop.f32.mrf.mxu1 }
 0x236   : > { %v806_v26 = vadd.f32 %v805_v24, %v636_v48 }
 0x238   : > { %v810_v28 = vcombine.low %v804_v25, %v806_v26 }
 0x23a   : > { %v817_v46 = vrot.slane %v810_v28, %v816_v27 }
 0x23c   : > { %v824_v29 = vrot.slane %v817_v46, %v816_v27 }
 0x23e   : > { %830 = vst.msk [vmem:[%s219_s13] sm:$0x3] %vm828_vm2, %v824_v29 }
 0x23f   : > { %1193 = shalt.err (!%p1190_p3)
}
 0x240   : > { %s1194_s6 = scalar_lea.hbm %s844_s17, 32  ;;  %s1198_s24 = scalar_lea.hbm %s1599_s5, 64 }
 0x241   : > { %p1195_p4 = scmp.ne.s32.totalorder %s844_s17, %s1194_s6  ;;  %p1199_p9 = scmp.lt.s32.totalorder %s844_s17, %s1599_s5 }
 0x242   : > { %p1200_p10 = scmp.lt.s32.totalorder %s1198_s24, %s1194_s6 }
 0x243   : > { %p1196_p7 = pnand %p1195_p4, %p1312_p5 }
 0x244   : > { %p1201_p11 = por %p1200_p10, %p1199_p9 }
 0x245   : > { %p1197_p8 = pneg %p1196_p7 }
 0x247   : > { %p1202_p12 = pnand %p1201_p11, %p1197_p8 }
 0x249   : > { %1205 = shalt.err (!%p1202_p12)
}
 0x24a   : > { %1140 = dma.vmem_to_hbm [thread:$0]  (%p1312_p5), %s847_s14, 32, %s844_s17, %s832_s18  }
 0x24b PF: > { %p1146_p13 = scmp.ge.s32.totalorder %s1240_s23, 2  ;;  %s858_s11 = sand.u32 1, %s1228_s20  }
 0x24c   : > { %s859_s12 = scalar_lea.sflag [#allocation4], %s858_s11 }
 0x24d   : > { %p1143_p0 = pnand %p1146_p13, %p1316_p6 }
 0x24f   : > { %p1144_p1 = pneg %p1143_p0 }
 0x251   : > { %1223 = dma.done.wait (%p1144_p1), %s859_s12, 32  }
 0x252   : > { %1225 = vsyncadd (%p1144_p1), %s859_s12, 4294967264  ;;  %p16_p2 = scmp.ge.s32.totalorder %s1300_s25, 4   ;;  %s1602_s20 = smov %s1232_s21 }
 0x253   : > { %s1603_s21 = smov %s1236_s22  ;;  %s1604_s22 = smov %s1310_s28 }
 0x254   : > { %s1605_s23 = smov %s1300_s25  ;;  %18 = sbr.rel (!%p16_p2) target bundleno = 5 (0x5), region = 75 }
 0x259   :  { %864 = vsyncpa [#allocation4], 1 }
 0x25a   :  { %866 = vsyncpa [#allocation4 + $0x1], 1 }

// kernel: tpu_custom_call.1
= control target key start
LH: loop header
LB: loop body
LE: loop exit
PB: predicated region body
PF: predicated region fallthrough
CT: control target
= control target key end

     0   :  { %s1139_s20 = smov 0   ;;  %s1477_s0 = inlined_call_operand.vmem [shape: f32[512,112], index: 0, kind: input, shape index: {}]   ;;  %s1478_s1 = inlined_call_operand.vmem [shape: f32[112,48], index: 1, kind: input, shape index: {}]   ;;  %s1479_s2 = inlined_call_operand.vmem [shape: f32[1,48], index: 2, kind: input, shape index: {}]   ;;  %s1480_s3 = inlined_call_operand.vmem [shape: f32[1,48], index: 3, kind: input, shape index: {}]   ;;  %s1481_s4 = inlined_call_operand.<no memory space> [shape: f32[1], index: 4, kind: input, shape index: {}]   ;;  %s1482_s5 = inlined_call_operand.vmem [shape: f32[512,1], index: 5, kind: output, shape index: {}]  }
   0x1   :  { %10 = sst [smem:[#allocation2]] %s1481_s4 }
   0x2 LB: > { %s895_s21 = sadd.s32 4294967295, %s1104_s20   ;;  %p899_p0 = scmp.ge.s32.totalorder %s1104_s20, 1  ;;  %s1104_s20 = sphi %s1139_s20, %s16_s20  }
   0x3   : > { %p189_p1 = scmp.lt.s32.totalorder %s1104_s20, 3 }
   0x5   : > { %p190_p2 = pnand %p899_p0, %p189_p1 }
   0x6   : > { %s900_s8 = sshll.u32 (!%p190_p2), %s895_s21, 5  ;;  %s772_s9 = sld [smem:[#allocation2]] (!%p190_p2) }
   0x7   : > { %193 = sbr.rel (%p190_p2) target bundleno = 444 (0x1bc), region = 40  ;;  %p218_p3 = scmp.lt.s32.totalorder (!%p190_p2), %s900_s8, 63 }
   0xc   : > { %v274_v0 = vld [vmem:[%s1478_s1 + $0x68] sm:$0xff]  ;;  %v273_v1 = vld [vmem:[%s1478_s1 + $0x60] sm:$0xff]  ;;  %v272_v2 = vld [vmem:[%s1478_s1 + $0x58] sm:$0xff]  ;;  %s1484_s8 = smov (!%p218_p3, %s900_s8), 63  ;;  %vm282_vm0 = vcmask 916480   ;;  %vm675_vm1 = vcmask 392192  }
   0xd   : > { %986 = vmatprep.subr.mxu0 %v274_v0  ;;  %1062 = vmatprep.subr.mxu1 %v274_v0  ;;  %v271_v3 = vld [vmem:[%s1478_s1 + $0x50] sm:$0xff]  ;;  %v270_v4 = vld [vmem:[%s1478_s1 + $0x48] sm:$0xff]  ;;  %v269_v5 = vld [vmem:[%s1478_s1 + $0x40] sm:$0xff]  ;;  %s901_s22 = sshll.u32 %s1484_s8, 3  ;;  %vm806_vm2 = vcmask 7168  }
   0xe   : > { %987 = vmatpush3.msra.mxu0 %v274_v0  ;;  %1076 = vmatpush3.msra.mxu1 %v274_v0  ;;  %v268_v6 = vld [vmem:[%s1478_s1 + $0x38] sm:$0xff]  ;;  %v267_v7 = vld [vmem:[%s1478_s1 + $0x30] sm:$0xff]  ;;  %v266_v8 = vld [vmem:[%s1478_s1 + $0x28] sm:$0xff]  ;;  %s1194_s26 = scalar_lea.vmem %s1477_s0, %s901_s22  ;;  %s1376_s12 = scalar_lea.vmem %s1482_s5, %s901_s22 }
   0xf   : > { %988 = vmatprep.subr.mxu0 %v273_v1  ;;  %1063 = vmatprep.subr.mxu1 %v273_v1  ;;  %v265_v9 = vld [vmem:[%s1478_s1 + $0x20] sm:$0xff]  ;;  %v264_v10 = vld [vmem:[%s1478_s1 + $0x18] sm:$0xff]  ;;  %v263_v11 = vld [vmem:[%s1478_s1 + $0x10] sm:$0xff] }
  0x10   : > { %989 = vmatpush3.msra.mxu0 %v273_v1  ;;  %1077 = vmatpush3.msra.mxu1 %v273_v1  ;;  %v262_v12 = vld [vmem:[%s1478_s1 + $0x8] sm:$0xff]  ;;  %v261_v13 = vld [vmem:[%s1478_s1] sm:$0xff]  ;;  %v231_v18 = vld [vmem:[%s1194_s26 + $0x10] sm:$0xff] }
  0x11   : > { %990 = vmatprep.subr.mxu0 %v272_v2  ;;  %1064 = vmatprep.subr.mxu1 %v272_v2  ;;  %v229_v14 = vld [vmem:[%s1194_s26] sm:$0xff]  ;;  %v230_v16 = vld [vmem:[%s1194_s26 + $0x8] sm:$0xff]  ;;  %v247_v19 = vld [vmem:[%s1194_s26 + $0x90] sm:$0xff] }
  0x12   : > { %991 = vmatpush3.msra.mxu0 %v272_v2  ;;  %1078 = vmatpush3.msra.mxu1 %v272_v2  ;;  %v245_v15 = vld [vmem:[%s1194_s26 + $0x80] sm:$0xff]  ;;  %v246_v17 = vld [vmem:[%s1194_s26 + $0x88] sm:$0xff]  ;;  %v232_v20 = vld [vmem:[%s1194_s26 + $0x18] sm:$0xff] }
  0x13   : > { %992 = vmatprep.subr.mxu0 %v271_v3  ;;  %1065 = vmatprep.subr.mxu1 %v271_v3  ;;  %v248_v21 = vld [vmem:[%s1194_s26 + $0x98] sm:$0xff]  ;;  %v233_v22 = vld [vmem:[%s1194_s26 + $0x20] sm:$0xff]  ;;  %v234_v24 = vld [vmem:[%s1194_s26 + $0x28] sm:$0xff] }
  0x14   : > { %993 = vmatpush3.msra.mxu0 %v271_v3  ;;  %1079 = vmatpush3.msra.mxu1 %v271_v3  ;;  %v249_v23 = vld [vmem:[%s1194_s26 + $0xa0] sm:$0xff]  ;;  %v250_v25 = vld [vmem:[%s1194_s26 + $0xa8] sm:$0xff]  ;;  %v235_v26 = vld [vmem:[%s1194_s26 + $0x30] sm:$0xff] }
  0x15   : > { %994 = vmatprep.subr.mxu0 %v270_v4  ;;  %1066 = vmatprep.subr.mxu1 %v270_v4  ;;  %v251_v27 = vld [vmem:[%s1194_s26 + $0xb0] sm:$0xff]  ;;  %v236_v28 = vld [vmem:[%s1194_s26 + $0x38] sm:$0xff]  ;;  %v237_v30 = vld [vmem:[%s1194_s26 + $0x40] sm:$0xff] }
  0x16   : > { %995 = vmatpush3.msra.mxu0 %v270_v4  ;;  %1080 = vmatpush3.msra.mxu1 %v270_v4  ;;  %v252_v29 = vld [vmem:[%s1194_s26 + $0xb8] sm:$0xff]  ;;  %v253_v31 = vld [vmem:[%s1194_s26 + $0xc0] sm:$0xff]  ;;  %v238_v32 = vld [vmem:[%s1194_s26 + $0x48] sm:$0xff] }
  0x17   : > { %996 = vmatprep.subr.mxu0 %v269_v5  ;;  %1067 = vmatprep.subr.mxu1 %v269_v5  ;;  %v254_v33 = vld [vmem:[%s1194_s26 + $0xc8] sm:$0xff]  ;;  %v239_v34 = vld [vmem:[%s1194_s26 + $0x50] sm:$0xff]  ;;  %v240_v36 = vld [vmem:[%s1194_s26 + $0x58] sm:$0xff] }
  0x18   : > { %997 = vmatpush3.msra.mxu0 %v269_v5  ;;  %1081 = vmatpush3.msra.mxu1 %v269_v5  ;;  %v255_v35 = vld [vmem:[%s1194_s26 + $0xd0] sm:$0xff]  ;;  %v256_v37 = vld [vmem:[%s1194_s26 + $0xd8] sm:$0xff]  ;;  %v241_v38 = vld [vmem:[%s1194_s26 + $0x60] sm:$0xff] }
  0x19   : > { %998 = vmatprep.subr.mxu0 %v268_v6  ;;  %1068 = vmatprep.subr.mxu1 %v268_v6  ;;  %v257_v39 = vld [vmem:[%s1194_s26 + $0xe0] sm:$0xff]  ;;  %v242_v40 = vld [vmem:[%s1194_s26 + $0x68] sm:$0xff]  ;;  %v243_v42 = vld [vmem:[%s1194_s26 + $0x70] sm:$0xff] }
  0x1a   : > { %999 = vmatpush3.msra.mxu0 %v268_v6  ;;  %1082 = vmatpush3.msra.mxu1 %v268_v6  ;;  %v258_v41 = vld [vmem:[%s1194_s26 + $0xe8] sm:$0xff]  ;;  %v259_v43 = vld [vmem:[%s1194_s26 + $0xf0] sm:$0xff]  ;;  %v244_v44 = vld [vmem:[%s1194_s26 + $0x78] sm:$0xff] }
  0x1b   : > { %1000 = vmatprep.subr.mxu0 %v267_v7  ;;  %1069 = vmatprep.subr.mxu1 %v267_v7  ;;  %v260_v45 = vld [vmem:[%s1194_s26 + $0xf8] sm:$0xff]  ;;  %v1266_v46 = vld [vmem:[%s1479_s2] ss:$0 sm:$0xff] }
  0x1c   : > { %1001 = vmatpush3.msra.mxu0 %v267_v7  ;;  %1083 = vmatpush3.msra.mxu1 %v267_v7  ;;  %v1275_v57 = vld [vmem:[%s1480_s3] ss:$0 sm:$0xff] }
  0x1d   : > { %1002 = vmatprep.subr.mxu0 %v266_v8  ;;  %1070 = vmatprep.subr.mxu1 %v266_v8 }
  0x1e   : > { %1003 = vmatpush3.msra.mxu0 %v266_v8  ;;  %1084 = vmatpush3.msra.mxu1 %v266_v8 }
  0x1f   : > { %1004 = vmatprep.subr.mxu0 %v265_v9  ;;  %1071 = vmatprep.subr.mxu1 %v265_v9 }
  0x20   : > { %1005 = vmatpush3.msra.mxu0 %v265_v9  ;;  %1085 = vmatpush3.msra.mxu1 %v265_v9 }
  0x21   : > { %1006 = vmatprep.subr.mxu0 %v264_v10  ;;  %1072 = vmatprep.subr.mxu1 %v264_v10 }
  0x22   : > { %1007 = vmatpush3.msra.mxu0 %v264_v10  ;;  %1086 = vmatpush3.msra.mxu1 %v264_v10 }
  0x23   : > { %1008 = vmatprep.subr.mxu0 %v263_v11  ;;  %1073 = vmatprep.subr.mxu1 %v263_v11 }
  0x24   : > { %1009 = vmatpush3.msra.mxu0 %v263_v11  ;;  %1087 = vmatpush3.msra.mxu1 %v263_v11 }
  0x25   : > { %1010 = vmatprep.subr.mxu0 %v262_v12  ;;  %1074 = vmatprep.subr.mxu1 %v262_v12 }
  0x26   : > { %1011 = vmatpush3.msra.mxu0 %v262_v12  ;;  %1088 = vmatpush3.msra.mxu1 %v262_v12 }
  0x27   : > { %1012 = vmatprep.subr.mxu0 %v261_v13  ;;  %1075 = vmatprep.subr.mxu1 %v261_v13 }
  0x28   : > { %1013 = vmatpush3.msra.mxu0 %v261_v13  ;;  %1089 = vmatpush3.msra.mxu1 %v261_v13 }
  0x29   : > { %1014 = vmatprep.mubr.msk.f32.mxu0 %vm282_vm0, %v229_v14  ;;  %1038 = vmatprep.mubr.msk.f32.mxu1 %vm282_vm0, %v245_v15 }
  0x2a   : > { %1015 = vmatmul.mubr.msk.f32.vlgmr.msra.gmra.mxu0 %vm282_vm0, %v230_v16  ;;  %1039 = vmatmul.mubr.msk.f32.vlgmr.msra.gmra.mxu1 %vm282_vm0, %v246_v17 }
  0x2b   : > { %1017 = vmatprep.mubr.msk.f32.mxu0 %vm282_vm0, %v231_v18  ;;  %1041 = vmatprep.mubr.msk.f32.mxu1 %vm282_vm0, %v247_v19 }
  0x2e   : > { %1018 = vmatmul.mubr.msk.f32.gmra.mxu0 %vm282_vm0, %v232_v20  ;;  %1042 = vmatmul.mubr.msk.f32.gmra.mxu1 %vm282_vm0, %v248_v21 }
  0x2f   : > { %1020 = vmatprep.mubr.msk.f32.mxu0 %vm282_vm0, %v233_v22  ;;  %1044 = vmatprep.mubr.msk.f32.mxu1 %vm282_vm0, %v249_v23 }
  0x32   : > { %1021 = vmatmul.mubr.msk.f32.gmra.mxu0 %vm282_vm0, %v234_v24  ;;  %1045 = vmatmul.mubr.msk.f32.gmra.mxu1 %vm282_vm0, %v250_v25 }
  0x33   : > { %1023 = vmatprep.mubr.msk.f32.mxu0 %vm282_vm0, %v235_v26  ;;  %1047 = vmatprep.mubr.msk.f32.mxu1 %vm282_vm0, %v251_v27 }
  0x36   : > { %1024 = vmatmul.mubr.msk.f32.gmra.mxu0 %vm282_vm0, %v236_v28  ;;  %1048 = vmatmul.mubr.msk.f32.gmra.mxu1 %vm282_vm0, %v252_v29 }
  0x37   : > { %1026 = vmatprep.mubr.msk.f32.mxu0 %vm282_vm0, %v237_v30  ;;  %1050 = vmatprep.mubr.msk.f32.mxu1 %vm282_vm0, %v253_v31 }
  0x3a   : > { %1027 = vmatmul.mubr.msk.f32.gmra.mxu0 %vm282_vm0, %v238_v32  ;;  %1051 = vmatmul.mubr.msk.f32.gmra.mxu1 %vm282_vm0, %v254_v33 }
  0x3b   : > { %1029 = vmatprep.mubr.msk.f32.mxu0 %vm282_vm0, %v239_v34  ;;  %1053 = vmatprep.mubr.msk.f32.mxu1 %vm282_vm0, %v255_v35 }
  0x3e   : > { %1030 = vmatmul.mubr.msk.f32.gmra.mxu0 %vm282_vm0, %v240_v36  ;;  %1054 = vmatmul.mubr.msk.f32.gmra.mxu1 %vm282_vm0, %v256_v37 }
  0x3f   : > { %1032 = vmatprep.mubr.msk.f32.mxu0 %vm282_vm0, %v241_v38  ;;  %1056 = vmatprep.mubr.msk.f32.mxu1 %vm282_vm0, %v257_v39 }
  0x42   : > { %1033 = vmatmul.mubr.msk.f32.gmra.mxu0 %vm282_vm0, %v242_v40  ;;  %1057 = vmatmul.mubr.msk.f32.gmra.mxu1 %vm282_vm0, %v258_v41 }
  0x43   : > { %1035 = vmatprep.mubr.msk.f32.mxu0 %vm282_vm0, %v243_v42  ;;  %1059 = vmatprep.mubr.msk.f32.mxu1 %vm282_vm0, %v259_v43 }
  0x46   : > { %1036 = vmatmul.mubr.msk.f32.gmra.mxu0 %vm282_vm0, %v244_v44  ;;  %1060 = vmatmul.mubr.msk.f32.gmra.mxu1 %vm282_vm0, %v260_v45 }
  0xea   : > { %v1016_v47 = vpop.f32.mrf.mxu0  ;;  %v1040_v48 = vpop.f32.mrf.mxu1 }
  0xeb   : > { %v451_v49 = vadd.f32 %v1016_v47, %v1266_v46  ;;  %v531_v50 = vadd.f32 %v1040_v48, %v1266_v46 }
  0xec   : > { %v445_v51 = vpop.f32.mrf.mxu0  ;;  %v525_v52 = vpop.f32.mrf.mxu1 }
  0xed   : > { %v605_v53 = vmax.f32 %v451_v49, 0.0  ;;  %v621_v54 = vmax.f32 %v531_v50, 0.0  ;;  %v446_v55 = vadd.f32 %v1266_v46, %v445_v51  ;;  %v526_v56 = vadd.f32 %v1266_v46, %v525_v52 }
  0xee   : > { %v1019_v58 = vpop.f32.mrf.mxu0  ;;  %v1043_v59 = vpop.f32.mrf.mxu1 }
  0xef   : > { %v604_v60 = vmax.f32 %v446_v55, 0.0  ;;  %v461_v61 = vadd.f32 %v1019_v58, %v1266_v46  ;;  %v541_v62 = vadd.f32 %v1043_v59, %v1266_v46  ;;  %v660_v0 = vmul.f32 %v1275_v57, %v621_v54 }
  0xf0   : > { %v455_v63 = vpop.f32.mrf.mxu0  ;;  %v535_v1 = vpop.f32.mrf.mxu1  ;;  %v644_v2 = vmul.f32 %v1275_v57, %v605_v53  ;;  %v620_v3 = vmax.f32 %v526_v56, 0.0 }
  0xf1   : > { %v607_v4 = vmax.f32 %v461_v61, 0.0  ;;  %v456_v5 = vadd.f32 %v1266_v46, %v455_v63  ;;  %v623_v6 = vmax.f32 %v541_v62, 0.0  ;;  %v727_v7 = vsel %vm675_vm1, %v660_v0, 0.0 }
  0xf2   : > { %v536_v8 = vadd.f32 %v1266_v46, %v535_v1  ;;  %v679_v9 = vsel %vm675_vm1, %v644_v2, 0.0  ;;  %v1022_v10 = vpop.f32.mrf.mxu0  ;;  %v643_v11 = vmul.f32 %v1275_v57, %v604_v60  ;;  %v1046_v12 = vpop.f32.mrf.mxu1  ;;  %728 = vadd.xlane.f32.xlu1 %v727_v7  ;;  %v659_v18 = vmul.f32 %v1275_v57, %v620_v3 }
  0xf3   : > { %680 = vadd.xlane.f32.xlu0 %v679_v9  ;;  %v646_v13 = vmul.f32 %v1275_v57, %v607_v4  ;;  %v662_v15 = vmul.f32 %v1275_v57, %v623_v6  ;;  %v471_v17 = vadd.f32 %v1022_v10, %v1266_v46  ;;  %v606_v19 = vmax.f32 %v456_v5, 0.0 }
  0xf4   : > { %v465_v14 = vpop.f32.mrf.mxu0  ;;  %v622_v20 = vmax.f32 %v536_v8, 0.0  ;;  %v676_v21 = vsel %vm675_vm1, %v643_v11, 0.0  ;;  %v545_v23 = vpop.f32.mrf.mxu1  ;;  %v551_v27 = vadd.f32 %v1046_v12, %v1266_v46  ;;  %v724_v30 = vsel %vm675_vm1, %v659_v18, 0.0 }
  0xf5   : > { %v685_v16 = vsel %vm675_vm1, %v646_v13, 0.0  ;;  %v466_v22 = vadd.f32 %v1266_v46, %v465_v14  ;;  %v733_v25 = vsel %vm675_vm1, %v662_v15, 0.0  ;;  %v609_v26 = vmax.f32 %v471_v17, 0.0 }
  0xf6   : > { %686 = vadd.xlane.f32.xlu1 %v685_v16  ;;  %v1025_v24 = vpop.f32.mrf.mxu0  ;;  %v546_v28 = vadd.f32 %v1266_v46, %v545_v23  ;;  %v645_v31 = vmul.f32 %v1275_v57, %v606_v19  ;;  %v661_v32 = vmul.f32 %v1275_v57, %v622_v20  ;;  %v1049_v34 = vpop.f32.mrf.mxu1  ;;  %v625_v35 = vmax.f32 %v551_v27, 0.0 }
  0xf7   : > { %677 = vadd.xlane.f32.xlu0 %v676_v21  ;;  %v608_v29 = vmax.f32 %v466_v22, 0.0  ;;  %v481_v37 = vadd.f32 %v1025_v24, %v1266_v46  ;;  %v648_v38 = vmul.f32 %v1275_v57, %v609_v26  ;;  %v561_v47 = vadd.f32 %v1049_v34, %v1266_v46 }
  0xf8   : > { %v475_v33 = vpop.f32.mrf.mxu0  ;;  %v624_v36 = vmax.f32 %v546_v28, 0.0  ;;  %v682_v39 = vsel %vm675_vm1, %v645_v31, 0.0  ;;  %v730_v40 = vsel %vm675_vm1, %v661_v32, 0.0  ;;  %v555_v43 = vpop.f32.mrf.mxu1  ;;  %v664_v49 = vmul.f32 %v1275_v57, %v625_v35 }
  0xf9   : > { %v476_v41 = vadd.f32 %v1266_v46, %v475_v33  ;;  %v647_v42 = vmul.f32 %v1275_v57, %v608_v29  ;;  %v611_v45 = vmax.f32 %v481_v37, 0.0  ;;  %v691_v48 = vsel %vm675_vm1, %v648_v38, 0.0 }
  0xfa   : > { %734 = vadd.xlane.f32.xlu1 %v733_v25  ;;  %v1028_v44 = vpop.f32.mrf.mxu0  ;;  %v556_v52 = vadd.f32 %v1266_v46, %v555_v43  ;;  %v663_v53 = vmul.f32 %v1275_v57, %v624_v36  ;;  %v1052_v55 = vpop.f32.mrf.mxu1  ;;  %v627_v56 = vmax.f32 %v561_v47, 0.0  ;;  %v739_v59 = vsel %vm675_vm1, %v664_v49, 0.0 }
  0xfb   : > { %725 = vadd.xlane.f32.xlu0 %v724_v30  ;;  %v610_v50 = vmax.f32 %v476_v41, 0.0  ;;  %v688_v51 = vsel %vm675_vm1, %v647_v42, 0.0  ;;  %v491_v58 = vadd.f32 %v1028_v44, %v1266_v46  ;;  %v650_v60 = vmul.f32 %v1275_v57, %v611_v45 }
  0xfc   : > { %v485_v54 = vpop.f32.mrf.mxu0  ;;  %v626_v61 = vmax.f32 %v556_v52, 0.0  ;;  %v736_v62 = vsel %vm675_vm1, %v663_v53, 0.0  ;;  %v565_v1 = vpop.f32.mrf.mxu1  ;;  %v571_v4 = vadd.f32 %v1052_v55, %v1266_v46  ;;  %v666_v6 = vmul.f32 %v1275_v57, %v627_v56 }
  0xfd   : > { %v486_v63 = vadd.f32 %v1266_v46, %v485_v54  ;;  %v649_v0 = vmul.f32 %v1275_v57, %v610_v50  ;;  %v613_v3 = vmax.f32 %v491_v58, 0.0  ;;  %v697_v5 = vsel %vm675_vm1, %v650_v60, 0.0 }
  0xfe   : > { %683 = vadd.xlane.f32.xlu1 %v682_v39  ;;  %v1031_v2 = vpop.f32.mrf.mxu0  ;;  %v566_v9 = vadd.f32 %v1266_v46, %v565_v1  ;;  %v665_v10 = vmul.f32 %v1275_v57, %v626_v61  ;;  %v1055_v12 = vpop.f32.mrf.mxu1  ;;  %v629_v13 = vmax.f32 %v571_v4, 0.0  ;;  %v745_v15 = vsel %vm675_vm1, %v666_v6, 0.0 }
  0xff   : > { %731 = vadd.xlane.f32.xlu0 %v730_v40  ;;  %v612_v7 = vmax.f32 %v486_v63, 0.0  ;;  %v694_v8 = vsel %vm675_vm1, %v649_v0, 0.0  ;;  %v501_v14 = vadd.f32 %v1031_v2, %v1266_v46  ;;  %v652_v16 = vmul.f32 %v1275_v57, %v613_v3 }
 0x100   : > { %v495_v11 = vpop.f32.mrf.mxu0  ;;  %v628_v17 = vmax.f32 %v566_v9, 0.0  ;;  %v742_v18 = vsel %vm675_vm1, %v665_v10, 0.0  ;;  %v575_v21 = vpop.f32.mrf.mxu1  ;;  %v581_v24 = vadd.f32 %v1055_v12, %v1266_v46  ;;  %v668_v26 = vmul.f32 %v1275_v57, %v629_v13 }
 0x101   : > { %v496_v19 = vadd.f32 %v1266_v46, %v495_v11  ;;  %v651_v20 = vmul.f32 %v1275_v57, %v612_v7  ;;  %v615_v23 = vmax.f32 %v501_v14, 0.0  ;;  %v703_v25 = vsel %vm675_vm1, %v652_v16, 0.0 }
 0x102   : > { %692 = vadd.xlane.f32.xlu1 %v691_v48  ;;  %v1034_v22 = vpop.f32.mrf.mxu0  ;;  %v576_v29 = vadd.f32 %v1266_v46, %v575_v21  ;;  %v667_v30 = vmul.f32 %v1275_v57, %v628_v17  ;;  %v1058_v32 = vpop.f32.mrf.mxu1  ;;  %v631_v33 = vmax.f32 %v581_v24, 0.0  ;;  %v751_v35 = vsel %vm675_vm1, %v668_v26, 0.0 }
 0x103   : > { %689 = vadd.xlane.f32.xlu0 %v688_v51  ;;  %v614_v27 = vmax.f32 %v496_v19, 0.0  ;;  %v700_v28 = vsel %vm675_vm1, %v651_v20, 0.0  ;;  %v511_v34 = vadd.f32 %v1034_v22, %v1266_v46  ;;  %v654_v36 = vmul.f32 %v1275_v57, %v615_v23 }
 0x104   : > { %v505_v31 = vpop.f32.mrf.mxu0  ;;  %v630_v37 = vmax.f32 %v576_v29, 0.0  ;;  %v748_v38 = vsel %vm675_vm1, %v667_v30, 0.0  ;;  %v585_v41 = vpop.f32.mrf.mxu1  ;;  %v591_v44 = vadd.f32 %v1058_v32, %v1266_v46  ;;  %v670_v47 = vmul.f32 %v1275_v57, %v631_v33 }
 0x105   : > { %v506_v39 = vadd.f32 %v1266_v46, %v505_v31  ;;  %v653_v40 = vmul.f32 %v1275_v57, %v614_v27  ;;  %v617_v43 = vmax.f32 %v511_v34, 0.0  ;;  %v709_v45 = vsel %vm675_vm1, %v654_v36, 0.0 }
 0x106   : > { %740 = vadd.xlane.f32.xlu1 %v739_v59  ;;  %v1037_v42 = vpop.f32.mrf.mxu0  ;;  %v586_v50 = vadd.f32 %v1266_v46, %v585_v41  ;;  %v669_v51 = vmul.f32 %v1275_v57, %v630_v37  ;;  %v1061_v53 = vpop.f32.mrf.mxu1  ;;  %v633_v54 = vmax.f32 %v591_v44, 0.0  ;;  %v757_v56 = vsel %vm675_vm1, %v670_v47, 0.0 }
 0x107   : > { %737 = vadd.xlane.f32.xlu0 %v736_v62  ;;  %v616_v48 = vmax.f32 %v506_v39, 0.0  ;;  %v706_v49 = vsel %vm675_vm1, %v653_v40, 0.0  ;;  %v521_v55 = vadd.f32 %v1037_v42, %v1266_v46  ;;  %v656_v58 = vmul.f32 %v1275_v57, %v617_v43 }
 0x108   : > { %v515_v52 = vpop.f32.mrf.mxu0  ;;  %v632_v59 = vmax.f32 %v586_v50, 0.0  ;;  %v754_v60 = vsel %vm675_vm1, %v669_v51, 0.0  ;;  %v595_v63 = vpop.f32.mrf.mxu1  ;;  %v601_v1 = vadd.f32 %v1061_v53, %v1266_v46  ;;  %v672_v3 = vmul.f32 %v1275_v57, %v633_v54 }
 0x109   : > { %v516_v61 = vadd.f32 %v1266_v46, %v515_v52  ;;  %v655_v62 = vmul.f32 %v1275_v57, %v616_v48  ;;  %v619_v0 = vmax.f32 %v521_v55, 0.0  ;;  %v715_v2 = vsel %vm675_vm1, %v656_v58, 0.0 }
 0x10a   : > { %698 = vadd.xlane.f32.xlu1 %v697_v5  ;;  %v596_v6 = vadd.f32 %v1266_v46, %v595_v63  ;;  %v671_v7 = vmul.f32 %v1275_v57, %v632_v59  ;;  %v763_v9 = vsel %vm675_vm1, %v672_v3, 0.0  ;;  %v1369_v19 = vstv %s772_s9 }
 0x10b   : > { %695 = vadd.xlane.f32.xlu0 %v694_v8  ;;  %v618_v4 = vmax.f32 %v516_v61, 0.0  ;;  %v712_v5 = vsel %vm675_vm1, %v655_v62, 0.0  ;;  %v635_v8 = vmax.f32 %v601_v1, 0.0  ;;  %v658_v12 = vmul.f32 %v1275_v57, %v619_v0 }
 0x10c   : > { %v634_v10 = vmax.f32 %v596_v6, 0.0  ;;  %v760_v11 = vsel %vm675_vm1, %v671_v7, 0.0 }
 0x10d   : > { %v657_v13 = vmul.f32 %v1275_v57, %v618_v4  ;;  %v721_v14 = vsel %vm675_vm1, %v658_v12, 0.0 }
 0x10e   : > { %746 = vadd.xlane.f32.xlu1 %v745_v15  ;;  %v674_v15 = vmul.f32 %v1275_v57, %v635_v8  ;;  %v673_v16 = vmul.f32 %v1275_v57, %v634_v10 }
 0x10f   : > { %743 = vadd.xlane.f32.xlu0 %v742_v18  ;;  %v718_v46 = vsel %vm675_vm1, %v657_v13, 0.0 }
 0x110   : > { %v769_v17 = vsel %vm675_vm1, %v674_v15, 0.0  ;;  %v766_v18 = vsel %vm675_vm1, %v673_v16, 0.0 }
 0x112   : > { %704 = vadd.xlane.f32.xlu1 %v703_v25 }
 0x113   : > { %701 = vadd.xlane.f32.xlu0 %v700_v28 }
 0x116   : > { %752 = vadd.xlane.f32.xlu1 %v751_v35 }
 0x117   : > { %749 = vadd.xlane.f32.xlu0 %v748_v38 }
 0x11a   : > { %710 = vadd.xlane.f32.xlu1 %v709_v45 }
 0x11b   : > { %707 = vadd.xlane.f32.xlu0 %v706_v49 }
 0x11e   : > { %758 = vadd.xlane.f32.xlu1 %v757_v56 }
 0x11f   : > { %755 = vadd.xlane.f32.xlu0 %v754_v60 }
 0x122   : > { %716 = vadd.xlane.f32.xlu1 %v715_v2 }
 0x123   : > { %713 = vadd.xlane.f32.xlu0 %v712_v5 }
 0x126   : > { %764 = vadd.xlane.f32.xlu1 %v763_v9 }
 0x127   : > { %761 = vadd.xlane.f32.xlu0 %v760_v11 }
 0x12a   : > { %722 = vadd.xlane.f32.xlu1 %v721_v14 }
 0x12b   : > { %719 = vadd.xlane.f32.xlu0 %v718_v46 }
 0x12e   : > { %770 = vadd.xlane.f32.xlu1 %v769_v17 }
 0x12f   : > { %767 = vadd.xlane.f32.xlu0 %v766_v18 }
 0x17b   : > { %v729_v57 = vpop.xlane.xlu1 %728 }
 0x17c   : > { %v681_v20 = vpop.xlane.xlu0 %680  ;;  %v791_v21 = vadd.f32 %v1369_v19, %v729_v57 }
 0x17d   : > { %v775_v22 = vadd.f32 %v1369_v19, %v681_v20 }
 0x17e   : > { %824 = vst.msk [vmem:[%s1376_s12 + $0x88] sm:$0xff] %vm806_vm2, %v791_v21 }
 0x17f   : > { %808 = vst.msk [vmem:[%s1376_s12 + $0x8] sm:$0xff] %vm806_vm2, %v775_v22  ;;  %v687_v23 = vpop.xlane.xlu1 %686 }
 0x180   : > { %v678_v24 = vpop.xlane.xlu0 %677  ;;  %v777_v25 = vadd.f32 %v1369_v19, %v687_v23 }
 0x181   : > { %v774_v26 = vadd.f32 %v1369_v19, %v678_v24 }
 0x182   : > { %810 = vst.msk [vmem:[%s1376_s12 + $0x18] sm:$0xff] %vm806_vm2, %v777_v25 }
 0x183   : > { %807 = vst.msk [vmem:[%s1376_s12] sm:$0xff] %vm806_vm2, %v774_v26  ;;  %v735_v27 = vpop.xlane.xlu1 %734 }
 0x184   : > { %v726_v28 = vpop.xlane.xlu0 %725  ;;  %v793_v29 = vadd.f32 %v1369_v19, %v735_v27 }
 0x185   : > { %v790_v30 = vadd.f32 %v1369_v19, %v726_v28 }
 0x186   : > { %826 = vst.msk [vmem:[%s1376_s12 + $0x98] sm:$0xff] %vm806_vm2, %v793_v29 }
 0x187   : > { %823 = vst.msk [vmem:[%s1376_s12 + $0x80] sm:$0xff] %vm806_vm2, %v790_v30  ;;  %v684_v31 = vpop.xlane.xlu1 %683 }
 0x188   : > { %v732_v32 = vpop.xlane.xlu0 %731  ;;  %v776_v33 = vadd.f32 %v1369_v19, %v684_v31 }
 0x189   : > { %v792_v34 = vadd.f32 %v1369_v19, %v732_v32 }
 0x18a   : > { %809 = vst.msk [vmem:[%s1376_s12 + $0x10] sm:$0xff] %vm806_vm2, %v776_v33 }
 0x18b   : > { %825 = vst.msk [vmem:[%s1376_s12 + $0x90] sm:$0xff] %vm806_vm2, %v792_v34  ;;  %v693_v35 = vpop.xlane.xlu1 %692 }
 0x18c   : > { %v690_v36 = vpop.xlane.xlu0 %689  ;;  %v779_v37 = vadd.f32 %v1369_v19, %v693_v35 }
 0x18d   : > { %v778_v38 = vadd.f32 %v1369_v19, %v690_v36 }
 0x18e   : > { %812 = vst.msk [vmem:[%s1376_s12 + $0x28] sm:$0xff] %vm806_vm2, %v779_v37 }
 0x18f   : > { %811 = vst.msk [vmem:[%s1376_s12 + $0x20] sm:$0xff] %vm806_vm2, %v778_v38  ;;  %v741_v39 = vpop.xlane.xlu1 %740 }
 0x190   : > { %v738_v40 = vpop.xlane.xlu0 %737  ;;  %v795_v41 = vadd.f32 %v1369_v19, %v741_v39 }
 0x191   : > { %v794_v42 = vadd.f32 %v1369_v19, %v738_v40 }
 0x192   : > { %828 = vst.msk [vmem:[%s1376_s12 + $0xa8] sm:$0xff] %vm806_vm2, %v795_v41 }
 0x193   : > { %827 = vst.msk [vmem:[%s1376_s12 + $0xa0] sm:$0xff] %vm806_vm2, %v794_v42  ;;  %v699_v43 = vpop.xlane.xlu1 %698 }
 0x194   : > { %v696_v44 = vpop.xlane.xlu0 %695  ;;  %v781_v45 = vadd.f32 %v1369_v19, %v699_v43 }
 0x195   : > { %v780_v47 = vadd.f32 %v1369_v19, %v696_v44 }
 0x196   : > { %814 = vst.msk [vmem:[%s1376_s12 + $0x38] sm:$0xff] %vm806_vm2, %v781_v45 }
 0x197   : > { %813 = vst.msk [vmem:[%s1376_s12 + $0x30] sm:$0xff] %vm806_vm2, %v780_v47  ;;  %v747_v48 = vpop.xlane.xlu1 %746 }
 0x198   : > { %v744_v49 = vpop.xlane.xlu0 %743  ;;  %v797_v50 = vadd.f32 %v1369_v19, %v747_v48 }
 0x199   : > { %v796_v51 = vadd.f32 %v1369_v19, %v744_v49 }
 0x19a   : > { %830 = vst.msk [vmem:[%s1376_s12 + $0xb8] sm:$0xff] %vm806_vm2, %v797_v50 }
 0x19b   : > { %829 = vst.msk [vmem:[%s1376_s12 + $0xb0] sm:$0xff] %vm806_vm2, %v796_v51  ;;  %v705_v52 = vpop.xlane.xlu1 %704 }
 0x19c   : > { %v702_v53 = vpop.xlane.xlu0 %701  ;;  %v783_v54 = vadd.f32 %v1369_v19, %v705_v52 }
 0x19d   : > { %v782_v55 = vadd.f32 %v1369_v19, %v702_v53 }
 0x19e   : > { %816 = vst.msk [vmem:[%s1376_s12 + $0x48] sm:$0xff] %vm806_vm2, %v783_v54 }
 0x19f   : > { %815 = vst.msk [vmem:[%s1376_s12 + $0x40] sm:$0xff] %vm806_vm2, %v782_v55  ;;  %v753_v56 = vpop.xlane.xlu1 %752 }
 0x1a0   : > { %v750_v58 = vpop.xlane.xlu0 %749  ;;  %v799_v59 = vadd.f32 %v1369_v19, %v753_v56 }
 0x1a1   : > { %v798_v60 = vadd.f32 %v1369_v19, %v750_v58 }
 0x1a2   : > { %832 = vst.msk [vmem:[%s1376_s12 + $0xc8] sm:$0xff] %vm806_vm2, %v799_v59 }
 0x1a3   : > { %831 = vst.msk [vmem:[%s1376_s12 + $0xc0] sm:$0xff] %vm806_vm2, %v798_v60  ;;  %v711_v61 = vpop.xlane.xlu1 %710 }
 0x1a4   : > { %v708_v62 = vpop.xlane.xlu0 %707  ;;  %v785_v63 = vadd.f32 %v1369_v19, %v711_v61 }
 0x1a5   : > { %v784_v0 = vadd.f32 %v1369_v19, %v708_v62 }
 0x1a6   : > { %818 = vst.msk [vmem:[%s1376_s12 + $0x58] sm:$0xff] %vm806_vm2, %v785_v63 }
 0x1a7   : > { %817 = vst.msk [vmem:[%s1376_s12 + $0x50] sm:$0xff] %vm806_vm2, %v784_v0  ;;  %v759_v1 = vpop.xlane.xlu1 %758 }
 0x1a8   : > { %v756_v2 = vpop.xlane.xlu0 %755  ;;  %v801_v3 = vadd.f32 %v1369_v19, %v759_v1 }
 0x1a9   : > { %v800_v4 = vadd.f32 %v1369_v19, %v756_v2 }
 0x1aa   : > { %834 = vst.msk [vmem:[%s1376_s12 + $0xd8] sm:$0xff] %vm806_vm2, %v801_v3 }
 0x1ab   : > { %833 = vst.msk [vmem:[%s1376_s12 + $0xd0] sm:$0xff] %vm806_vm2, %v800_v4  ;;  %v717_v5 = vpop.xlane.xlu1 %716 }
 0x1ac   : > { %v714_v6 = vpop.xlane.xlu0 %713  ;;  %v787_v7 = vadd.f32 %v1369_v19, %v717_v5 }
 0x1ad   : > { %v786_v8 = vadd.f32 %v1369_v19, %v714_v6 }
 0x1ae   : > { %820 = vst.msk [vmem:[%s1376_s12 + $0x68] sm:$0xff] %vm806_vm2, %v787_v7 }
 0x1af   : > { %819 = vst.msk [vmem:[%s1376_s12 + $0x60] sm:$0xff] %vm806_vm2, %v786_v8  ;;  %v765_v9 = vpop.xlane.xlu1 %764 }
 0x1b0   : > { %v762_v10 = vpop.xlane.xlu0 %761  ;;  %v803_v11 = vadd.f32 %v1369_v19, %v765_v9 }
 0x1b1   : > { %v802_v12 = vadd.f32 %v1369_v19, %v762_v10 }
 0x1b2   : > { %836 = vst.msk [vmem:[%s1376_s12 + $0xe8] sm:$0xff] %vm806_vm2, %v803_v11 }
 0x1b3   : > { %835 = vst.msk [vmem:[%s1376_s12 + $0xe0] sm:$0xff] %vm806_vm2, %v802_v12  ;;  %v723_v13 = vpop.xlane.xlu1 %722 }
 0x1b4   : > { %v720_v14 = vpop.xlane.xlu0 %719  ;;  %v789_v46 = vadd.f32 %v1369_v19, %v723_v13 }
 0x1b5   : > { %v788_v15 = vadd.f32 %v1369_v19, %v720_v14 }
 0x1b6   : > { %822 = vst.msk [vmem:[%s1376_s12 + $0x78] sm:$0xff] %vm806_vm2, %v789_v46 }
 0x1b7   : > { %821 = vst.msk [vmem:[%s1376_s12 + $0x70] sm:$0xff] %vm806_vm2, %v788_v15  ;;  %v771_v16 = vpop.xlane.xlu1 %770 }
 0x1b8   : > { %v768_v17 = vpop.xlane.xlu0 %767  ;;  %v805_v18 = vadd.f32 %v1369_v19, %v771_v16 }
 0x1b9   : > { %v804_v57 = vadd.f32 %v1369_v19, %v768_v17 }
 0x1ba   : > { %838 = vst.msk [vmem:[%s1376_s12 + $0xf8] sm:$0xff] %vm806_vm2, %v805_v18 }
 0x1bb   : > { %837 = vst.msk [vmem:[%s1376_s12 + $0xf0] sm:$0xff] %vm806_vm2, %v804_v57 }
 0x1bc PF: > { %s16_s20 = sadd.s32 1, %s1104_s20  }
 0x1bd   : > { %p13_p4 = scmp.ge.s32.totalorder %s16_s20, 4  }
 0x1bf   :  { %15 = sbr.rel (!%p13_p4) target bundleno = 2 (0x2), region = 70 }

</bundles_post_ra>
